<compile_context>
chip_gen: v5e
topology: v5e:2x2
jax: 0.10.0
libtpu: 0.0.40
codegen_flags: <defaults>
</compile_context>

<pallas_src>
import math
from functools import partial

import jax
import jax.numpy as jnp
from jax.experimental import pallas as pl
from jax.experimental.pallas import tpu as pltpu


def _pick_tile(n, target, align):
    """Largest divisor of n that is <= target and a multiple of `align`;
    falls back to the full extent (always BlockSpec-legal)."""
    if n <= target:
        return n
    for t in range(min(target, n), 0, -1):
        if n % t == 0 and t % align == 0:
            return t
    return n


def _attention_kernel(x_ref, wqk_ref, wv_ref, g_ref, b_ref,
                      out_ref, alpha_ref, q_scr, k_scr,
                      *, bb, d_head, tk):
    # x_ref:     (BB, S, dim)  batch block, full sequence
    # wqk_ref:   (dim, 2D)     fused [Wq * 1/sqrt(D) | Wk] (pre-transposed)
    # wv_ref:    (dim, D)
    # g/b_ref:   (1, dim)      LayerNorm gamma / beta
    # out_ref:   (BB, dim)     resident across the key-tile axis
    # alpha_ref: (BB, S, TK)   one key tile of the attention weights
    # q_scr/k_scr: (BB, S, D)  VMEM scratch, persists across key tiles
    j = pl.program_id(1)  # key-tile index (innermost, "arbitrary")

    @pl.when(j == 0)
    def _project_and_reduce():
        # Fused Q|K projection (scale pre-folded into Wq), cached in VMEM
        # scratch for all key tiles of this batch block.
        for b_i in range(bb):                                         # static unroll
            qk = jnp.dot(x_ref[b_i], wqk_ref[...],
                         preferred_element_type=jnp.float32)          # (S, 2D)
            q_scr[b_i] = qk[:, :d_head].astype(q_scr.dtype)
            k_scr[b_i] = qk[:, d_head:].astype(k_scr.dtype)

        # Summed attention output: columns of alpha sum to 1, hence
        #   (alpha @ V).sum(1) == V.sum(1) == (x.sum(1)) @ Wv.
        xs = jnp.sum(x_ref[...].astype(jnp.float32), axis=1)          # (BB, dim)
        vs = jnp.dot(xs, wv_ref[...].astype(jnp.float32),
                     preferred_element_type=jnp.float32)              # (BB, D)
        # LayerNorm over the feature axis, eps = 1e-5 (PyTorch default).
        mu = jnp.mean(vs, axis=-1, keepdims=True)
        var = jnp.mean((vs - mu) ** 2, axis=-1, keepdims=True)
        normed = (vs - mu) * jax.lax.rsqrt(var + 1e-5)
        out_ref[...] = (normed * g_ref[...] + b_ref[...]).astype(out_ref.dtype)

    # Attention weights for this key tile, batched over BB in one shot
    # (exact: softmax normalizes over the query axis, fully inside the block).
    col0 = pl.multiple_of(j * tk, tk)
    k_tile = k_scr[:, pl.ds(col0, tk), :]                             # (BB, TK, D)
    s = jnp.einsum('bqd,bkd->bqk', q_scr[...], k_tile,
                   preferred_element_type=jnp.float32)                # (BB, S, TK)
    m = jnp.max(s, axis=1, keepdims=True)                             # (BB, 1, TK)
    e = jnp.exp(s - m)
    inv = 1.0 / jnp.sum(e, axis=1, keepdims=True)                     # (BB, 1, TK)
    alpha_ref[...] = (e * inv).astype(alpha_ref.dtype)


def attention_forward(x, wq, wk, wv, gamma, beta, *,
                      batch_block=8, key_block=512, compute_dtype=None):
    """x: (B, S, dim); wq/wk/wv: (dim, D) (i.e. nn.Linear weight transposed);
    gamma/beta: (dim,).  Returns (LayerNorm'd summed output (B, dim),
    attention weights alpha_n (B, S, S))."""
    B, S, dim = x.shape
    D = wq.shape[1]
    assert wq.shape == (dim, D) and wk.shape == (dim, D) and wv.shape == (dim, D)
    # LayerNorm(dim) on the summed (B, D) output requires dim_head*heads == dim.
    assert D == dim, "dim_head * heads must equal dim (as in the PyTorch module)"

    BB = _pick_tile(B, batch_block, 8)     # batch elements per grid step
    TK = _pick_tile(S, key_block, 128)     # key/column tile of alpha

    scale = 1.0 / math.sqrt(D)
    wqk = jnp.concatenate([wq * scale, wk], axis=1)     # fold 1/sqrt(D) into Wq
    scratch_dtype = jnp.float32
    if compute_dtype is not None:                       # optional bf16 MXU path
        x_in = x.astype(compute_dtype)
        wqk = wqk.astype(compute_dtype)
        wv_in = wv.astype(compute_dtype)
        scratch_dtype = compute_dtype
    else:
        x_in, wv_in = x, wv
    gamma2 = gamma.reshape(1, dim).astype(jnp.float32)
    beta2 = beta.reshape(1, dim).astype(jnp.float32)

    kernel = partial(_attention_kernel, bb=BB, d_head=D, tk=TK)

    out_shapes = (
        jax.ShapeDtypeStruct((B, dim), jnp.float32),    # LayerNorm'd output
        jax.ShapeDtypeStruct((B, S, S), jnp.float32),   # attention weights
    )

    return pl.pallas_call(
        kernel,
        out_shape=out_shapes,
        grid_spec=pltpu.PrefetchScalarGridSpec(
            num_scalar_prefetch=0,
            grid=(B // BB, S // TK),
            in_specs=[
                pl.BlockSpec((BB, S, dim), lambda b, j: (b, 0, 0)),   # x (full seq)
                pl.BlockSpec((dim, 2 * D), lambda b, j: (0, 0)),      # [Wq*s | Wk]
                pl.BlockSpec((dim, D), lambda b, j: (0, 0)),          # Wv
                pl.BlockSpec((1, dim), lambda b, j: (0, 0)),          # gamma
                pl.BlockSpec((1, dim), lambda b, j: (0, 0)),          # beta
            ],
            out_specs=[
                pl.BlockSpec((BB, dim), lambda b, j: (b, 0)),         # out (resident over j)
                pl.BlockSpec((BB, S, TK), lambda b, j: (b, 0, j)),    # alpha key tile
            ],
            scratch_shapes=[
                pltpu.VMEM((BB, S, D), scratch_dtype),   # Q (scale folded into Wq)
                pltpu.VMEM((BB, S, D), scratch_dtype),   # K
            ],
        ),
        compiler_params=pltpu.CompilerParams(
            dimension_semantics=("parallel", "arbitrary")),
    )(x_in, wqk, wv_in, gamma2, beta2)


def _reference(x, wq, wk, wv, gamma, beta):
    # Pure-JAX reference mirroring the PyTorch forward exactly.
    q = x @ wq
    k = x @ wk
    v = x @ wv
    d_k = k.shape[-1]
    scores = jnp.einsum("bid,bjd->bij", q, k) / math.sqrt(d_k)
    alpha = jax.nn.softmax(scores, axis=1)                 # dim=1 !
    out = jnp.einsum("bij,bjd->bid", alpha, v).sum(axis=1)
    mu = out.mean(-1, keepdims=True)
    var = ((out - mu) ** 2).mean(-1, keepdims=True)
    out = (out - mu) / jnp.sqrt(var + 1e-5) * gamma + beta
    return out, alpha


if __name__ == "__main__":
    # Small shapes consistent with the module: dim_head * heads == dim so the
    # LayerNorm(dim) on the summed output is well-defined.
    B, S = 2, 8
    heads, dim_head = 4, 8
    dim = heads * dim_head        # 32
    D = heads * dim_head          # 32

    key = jax.random.PRNGKey(0)
    kx, kq, kk, kv = jax.random.split(key, 4)

    x = jax.random.normal(kx, (B, S, dim), dtype=jnp.float32)
    # nn.Linear weight is (out, in); kernel uses the (in, out) transpose.
    wq = jax.random.normal(kq, (dim, D), dtype=jnp.float32) * 0.1
    wk = jax.random.normal(kk, (dim, D), dtype=jnp.float32) * 0.1
    wv = jax.random.normal(kv, (dim, D), dtype=jnp.float32) * 0.1
    gamma = jnp.ones((dim,), dtype=jnp.float32)
    beta = jnp.zeros((dim,), dtype=jnp.float32)

    out, alpha = attention_forward(x, wq, wk, wv, gamma, beta)
    jax.block_until_ready((out, alpha))

    out_ref, alpha_ref = _reference(x, wq, wk, wv, gamma, beta)
    assert jnp.allclose(out, out_ref, rtol=1e-4, atol=1e-4), "output mismatch"
    assert jnp.allclose(alpha, alpha_ref, rtol=1e-4, atol=1e-4), "alpha mismatch"

    print("KERNEL_OK")
</pallas_src>

<mosaic_0001>
module attributes {stable_mosaic.version = 11 : i64} {
  func.func @_attention_kernel(%arg0: i32, %arg1: i32, %arg2: memref<2x8x32xf32, #tpu.memory_space<vmem>>, %arg3: memref<32x64xf32, #tpu.memory_space<vmem>>, %arg4: memref<32x32xf32, #tpu.memory_space<vmem>>, %arg5: memref<1x32xf32, #tpu.memory_space<vmem>>, %arg6: memref<1x32xf32, #tpu.memory_space<vmem>>, %arg7: memref<2x32xf32, #tpu.memory_space<vmem>>, %arg8: memref<2x8x8xf32, #tpu.memory_space<vmem>>, %arg9: memref<2x8x32xf32, #tpu.memory_space<vmem>>, %arg10: memref<2x8x32xf32, #tpu.memory_space<vmem>>) attributes {dimension_semantics = [#tpu.dimension_semantics<parallel>, #tpu.dimension_semantics<arbitrary>], iteration_bounds = array<i64: 1, 1>, scalar_prefetch = 0 : i64, scratch_operands = 2 : i64, tpu.core_type = #tpu.core_type<tc>, window_params = [{transform_indices = @transform_0, window_bounds = array<i64: 2, 8, 32>}, {pipeline_mode = #tpu.pipeline_mode<synchronous>, transform_indices = @transform_1, window_bounds = array<i64: 32, 64>}, {pipeline_mode = #tpu.pipeline_mode<synchronous>, transform_indices = @transform_2, window_bounds = array<i64: 32, 32>}, {pipeline_mode = #tpu.pipeline_mode<synchronous>, transform_indices = @transform_3, window_bounds = array<i64: 1, 32>}, {pipeline_mode = #tpu.pipeline_mode<synchronous>, transform_indices = @transform_4, window_bounds = array<i64: 1, 32>}, {transform_indices = @transform_5, window_bounds = array<i64: 2, 32>}, {transform_indices = @transform_6, window_bounds = array<i64: 2, 8, 8>}]} {
    %c0_i32 = arith.constant 0 : i32
    %0 = arith.cmpi eq, %arg1, %c0_i32 : i32
    %1 = arith.extui %0 : i1 to i32
    %c0_i32_0 = arith.constant 0 : i32
    %2 = arith.cmpi ne, %1, %c0_i32_0 : i32
    scf.if %2 {
      %c0_11 = arith.constant 0 : index
      %c0_12 = arith.constant 0 : index
      %c0_13 = arith.constant 0 : index
      %21 = vector.load %arg2[%c0_11, %c0_12, %c0_13] : memref<2x8x32xf32, #tpu.memory_space<vmem>>, vector<1x8x32xf32>
      %22 = vector.shape_cast %21 : vector<1x8x32xf32> to vector<8x32xf32>
      %c0_14 = arith.constant 0 : index
      %c0_15 = arith.constant 0 : index
      %23 = vector.load %arg3[%c0_14, %c0_15] : memref<32x64xf32, #tpu.memory_space<vmem>>, vector<32x64xf32>
      %cst_16 = arith.constant dense<0.000000e+00> : vector<8x64xf32>
      %24 = tpu.matmul %22, %23, %cst_16 {dimension_numbers = #tpu.dot_dimension_numbers<[1], [0], [0], [1], [0, 0, 1, 1], [], []>} : vector<8x32xf32>, vector<32x64xf32>, vector<8x64xf32> -> vector<8x64xf32>
      %25 = vector.extract_strided_slice %24 {offsets = [0, 0], sizes = [8, 32], strides = [1, 1]} : vector<8x64xf32> to vector<8x32xf32>
      %c0_17 = arith.constant 0 : index
      %c0_18 = arith.constant 0 : index
      %c0_19 = arith.constant 0 : index
      %26 = vector.load %arg9[%c0_17, %c0_18, %c0_19] : memref<2x8x32xf32, #tpu.memory_space<vmem>>, vector<1x8x32xf32>
      %27 = vector.shape_cast %26 : vector<1x8x32xf32> to vector<8x32xf32>
      %28 = vector.shape_cast %25 : vector<8x32xf32> to vector<1x8x32xf32>
      tpu.vector_store %arg9[%c0_17, %c0_18, %c0_19], %28 {strides = array<i32>} : memref<2x8x32xf32, #tpu.memory_space<vmem>>, vector<1x8x32xf32>,
      %29 = vector.extract_strided_slice %24 {offsets = [0, 32], sizes = [8, 32], strides = [1, 1]} : vector<8x64xf32> to vector<8x32xf32>
      %c0_20 = arith.constant 0 : index
      %c0_21 = arith.constant 0 : index
      %c0_22 = arith.constant 0 : index
      %30 = vector.load %arg10[%c0_20, %c0_21, %c0_22] : memref<2x8x32xf32, #tpu.memory_space<vmem>>, vector<1x8x32xf32>
      %31 = vector.shape_cast %30 : vector<1x8x32xf32> to vector<8x32xf32>
      %32 = vector.shape_cast %29 : vector<8x32xf32> to vector<1x8x32xf32>
      tpu.vector_store %arg10[%c0_20, %c0_21, %c0_22], %32 {strides = array<i32>} : memref<2x8x32xf32, #tpu.memory_space<vmem>>, vector<1x8x32xf32>,
      %c1 = arith.constant 1 : index
      %c0_23 = arith.constant 0 : index
      %c0_24 = arith.constant 0 : index
      %33 = vector.load %arg2[%c1, %c0_23, %c0_24] : memref<2x8x32xf32, #tpu.memory_space<vmem>>, vector<1x8x32xf32>
      %34 = vector.shape_cast %33 : vector<1x8x32xf32> to vector<8x32xf32>
      %c0_25 = arith.constant 0 : index
      %c0_26 = arith.constant 0 : index
      %35 = vector.load %arg3[%c0_25, %c0_26] : memref<32x64xf32, #tpu.memory_space<vmem>>, vector<32x64xf32>
      %cst_27 = arith.constant dense<0.000000e+00> : vector<8x64xf32>
      %36 = tpu.matmul %34, %35, %cst_27 {dimension_numbers = #tpu.dot_dimension_numbers<[1], [0], [0], [1], [0, 0, 1, 1], [], []>} : vector<8x32xf32>, vector<32x64xf32>, vector<8x64xf32> -> vector<8x64xf32>
      %37 = vector.extract_strided_slice %36 {offsets = [0, 0], sizes = [8, 32], strides = [1, 1]} : vector<8x64xf32> to vector<8x32xf32>
      %c1_28 = arith.constant 1 : index
      %c0_29 = arith.constant 0 : index
      %c0_30 = arith.constant 0 : index
      %38 = vector.load %arg9[%c1_28, %c0_29, %c0_30] : memref<2x8x32xf32, #tpu.memory_space<vmem>>, vector<1x8x32xf32>
      %39 = vector.shape_cast %38 : vector<1x8x32xf32> to vector<8x32xf32>
      %40 = vector.shape_cast %37 : vector<8x32xf32> to vector<1x8x32xf32>
      tpu.vector_store %arg9[%c1_28, %c0_29, %c0_30], %40 {strides = array<i32>} : memref<2x8x32xf32, #tpu.memory_space<vmem>>, vector<1x8x32xf32>,
      %41 = vector.extract_strided_slice %36 {offsets = [0, 32], sizes = [8, 32], strides = [1, 1]} : vector<8x64xf32> to vector<8x32xf32>
      %c1_31 = arith.constant 1 : index
      %c0_32 = arith.constant 0 : index
      %c0_33 = arith.constant 0 : index
      %42 = vector.load %arg10[%c1_31, %c0_32, %c0_33] : memref<2x8x32xf32, #tpu.memory_space<vmem>>, vector<1x8x32xf32>
      %43 = vector.shape_cast %42 : vector<1x8x32xf32> to vector<8x32xf32>
      %44 = vector.shape_cast %41 : vector<8x32xf32> to vector<1x8x32xf32>
      tpu.vector_store %arg10[%c1_31, %c0_32, %c0_33], %44 {strides = array<i32>} : memref<2x8x32xf32, #tpu.memory_space<vmem>>, vector<1x8x32xf32>,
      %c0_34 = arith.constant 0 : index
      %c0_35 = arith.constant 0 : index
      %c0_36 = arith.constant 0 : index
      %45 = vector.load %arg2[%c0_34, %c0_35, %c0_36] : memref<2x8x32xf32, #tpu.memory_space<vmem>>, vector<2x8x32xf32>
      %cst_37 = arith.constant dense<0.000000e+00> : vector<2x32xf32>
      %46 = vector.multi_reduction <add>, %45, %cst_37 [1] : vector<2x8x32xf32> to vector<2x32xf32>
      %c0_38 = arith.constant 0 : index
      %c0_39 = arith.constant 0 : index
      %47 = vector.load %arg4[%c0_38, %c0_39] : memref<32x32xf32, #tpu.memory_space<vmem>>, vector<32x32xf32>
      %cst_40 = arith.constant dense<0.000000e+00> : vector<2x32xf32>
      %48 = tpu.matmul %46, %47, %cst_40 {dimension_numbers = #tpu.dot_dimension_numbers<[1], [0], [0], [1], [0, 0, 1, 1], [], []>} : vector<2x32xf32>, vector<32x32xf32>, vector<2x32xf32> -> vector<2x32xf32>
      %cst_41 = arith.constant dense<0.000000e+00> : vector<2xf32>
      %49 = vector.multi_reduction <add>, %48, %cst_41 [1] : vector<2x32xf32> to vector<2xf32>
      %50 = vector.shape_cast %49 : vector<2xf32> to vector<2x1xf32>
      %cst_42 = arith.constant 3.200000e+01 : f32
      %51 = vector.broadcast %cst_42 : f32 to vector<2x1xf32>
      %52 = arith.divf %50, %51 : vector<2x1xf32>
      %53 = vector.broadcast %52 : vector<2x1xf32> to vector<2x32xf32>
      %54 = arith.subf %48, %53 : vector<2x32xf32>
      %55 = arith.mulf %54, %54 : vector<2x32xf32>
      %cst_43 = arith.constant dense<0.000000e+00> : vector<2xf32>
      %56 = vector.multi_reduction <add>, %55, %cst_43 [1] : vector<2x32xf32> to vector<2xf32>
      %57 = vector.shape_cast %56 : vector<2xf32> to vector<2x1xf32>
      %cst_44 = arith.constant 3.200000e+01 : f32
      %58 = vector.broadcast %cst_44 : f32 to vector<2x1xf32>
      %59 = arith.divf %57, %58 : vector<2x1xf32>
      %60 = vector.broadcast %52 : vector<2x1xf32> to vector<2x32xf32>
      %61 = arith.subf %48, %60 : vector<2x32xf32>
      %cst_45 = arith.constant 9.99999974E-6 : f32
      %62 = vector.broadcast %cst_45 : f32 to vector<2x1xf32>
      %63 = arith.addf %59, %62 : vector<2x1xf32>
      %64 = math.rsqrt %63 : vector<2x1xf32>
      %65 = vector.broadcast %64 : vector<2x1xf32> to vector<2x32xf32>
      %66 = arith.mulf %61, %65 : vector<2x32xf32>
      %c0_46 = arith.constant 0 : index
      %c0_47 = arith.constant 0 : index
      %67 = vector.load %arg5[%c0_46, %c0_47] : memref<1x32xf32, #tpu.memory_space<vmem>>, vector<1x32xf32>
      %68 = vector.broadcast %67 : vector<1x32xf32> to vector<2x32xf32>
      %69 = arith.mulf %66, %68 : vector<2x32xf32>
      %c0_48 = arith.constant 0 : index
      %c0_49 = arith.constant 0 : index
      %70 = vector.load %arg6[%c0_48, %c0_49] : memref<1x32xf32, #tpu.memory_space<vmem>>, vector<1x32xf32>
      %71 = vector.broadcast %70 : vector<1x32xf32> to vector<2x32xf32>
      %72 = arith.addf %69, %71 : vector<2x32xf32>
      %c0_50 = arith.constant 0 : index
      %c0_51 = arith.constant 0 : index
      %73 = vector.load %arg7[%c0_50, %c0_51] : memref<2x32xf32, #tpu.memory_space<vmem>>, vector<2x32xf32>
      tpu.vector_store %arg7[%c0_50, %c0_51], %72 {strides = array<i32>} : memref<2x32xf32, #tpu.memory_space<vmem>>, vector<2x32xf32>,
    } else {
    }
    %c8_i32 = arith.constant 8 : i32
    %3 = arith.muli %arg1, %c8_i32 : i32
    %4 = tpu.assume_multiple %3, 8 : i32
    %c0 = arith.constant 0 : index
    %5 = arith.index_cast %4 : i32 to index
    %c0_1 = arith.constant 0 : index
    %6 = vector.load %arg10[%c0, %5, %c0_1] : memref<2x8x32xf32, #tpu.memory_space<vmem>>, vector<2x8x32xf32>
    %c0_2 = arith.constant 0 : index
    %c0_3 = arith.constant 0 : index
    %c0_4 = arith.constant 0 : index
    %7 = vector.load %arg9[%c0_2, %c0_3, %c0_4] : memref<2x8x32xf32, #tpu.memory_space<vmem>>, vector<2x8x32xf32>
    "tpu.trace_start"() <{level = 10 : i32, message = "bqd,bkd->bqk"}> : () -> ()
    %cst = arith.constant dense<0.000000e+00> : vector<2x8x8xf32>
    %8 = tpu.matmul %7, %6, %cst {dimension_numbers = #tpu.dot_dimension_numbers<[2], [2], [1], [1], [0, 0, 0, 1, 1, 1], [0], [0]>} : vector<2x8x32xf32>, vector<2x8x32xf32>, vector<2x8x8xf32> -> vector<2x8x8xf32>
    "tpu.trace_stop"() : () -> ()
    %cst_5 = arith.constant dense<0xFF800000> : vector<2x8xf32>
    %9 = vector.multi_reduction <maximumf>, %8, %cst_5 [1] : vector<2x8x8xf32> to vector<2x8xf32>
    %10 = vector.shape_cast %9 : vector<2x8xf32> to vector<2x1x8xf32>
    %11 = vector.broadcast %10 : vector<2x1x8xf32> to vector<2x8x8xf32>
    %12 = arith.subf %8, %11 : vector<2x8x8xf32>
    %13 = math.exp %12 : vector<2x8x8xf32>
    %cst_6 = arith.constant dense<0.000000e+00> : vector<2x8xf32>
    %14 = vector.multi_reduction <add>, %13, %cst_6 [1] : vector<2x8x8xf32> to vector<2x8xf32>
    %15 = vector.shape_cast %14 : vector<2x8xf32> to vector<2x1x8xf32>
    %cst_7 = arith.constant 1.000000e+00 : f32
    %16 = vector.broadcast %cst_7 : f32 to vector<2x1x8xf32>
    %17 = arith.divf %16, %15 : vector<2x1x8xf32>
    %18 = vector.broadcast %17 : vector<2x1x8xf32> to vector<2x8x8xf32>
    %19 = arith.mulf %13, %18 : vector<2x8x8xf32>
    %c0_8 = arith.constant 0 : index
    %c0_9 = arith.constant 0 : index
    %c0_10 = arith.constant 0 : index
    %20 = vector.load %arg8[%c0_8, %c0_9, %c0_10] : memref<2x8x8xf32, #tpu.memory_space<vmem>>, vector<2x8x8xf32>
    tpu.vector_store %arg8[%c0_8, %c0_9, %c0_10], %19 {strides = array<i32>} : memref<2x8x8xf32, #tpu.memory_space<vmem>>, vector<2x8x8xf32>,
    return
  }
  func.func @transform_0(%arg0: i32, %arg1: i32) -> (i32, i32, i32) {
    %c0_i32 = arith.constant 0 : i32
    %c0_i32_0 = arith.constant 0 : i32
    %c0_i32_1 = arith.constant 0 : i32
    return %arg0, %c0_i32, %c0_i32_0 : i32, i32, i32
  }
  func.func @transform_1(%arg0: i32, %arg1: i32) -> (i32, i32) {
    %c0_i32 = arith.constant 0 : i32
    %c0_i32_0 = arith.constant 0 : i32
    %c0_i32_1 = arith.constant 0 : i32
    return %c0_i32, %c0_i32_0 : i32, i32
  }
  func.func @transform_2(%arg0: i32, %arg1: i32) -> (i32, i32) {
    %c0_i32 = arith.constant 0 : i32
    %c0_i32_0 = arith.constant 0 : i32
    %c0_i32_1 = arith.constant 0 : i32
    return %c0_i32, %c0_i32_0 : i32, i32
  }
  func.func @transform_3(%arg0: i32, %arg1: i32) -> (i32, i32) {
    %c0_i32 = arith.constant 0 : i32
    %c0_i32_0 = arith.constant 0 : i32
    %c0_i32_1 = arith.constant 0 : i32
    return %c0_i32, %c0_i32_0 : i32, i32
  }
  func.func @transform_4(%arg0: i32, %arg1: i32) -> (i32, i32) {
    %c0_i32 = arith.constant 0 : i32
    %c0_i32_0 = arith.constant 0 : i32
    %c0_i32_1 = arith.constant 0 : i32
    return %c0_i32, %c0_i32_0 : i32, i32
  }
  func.func @transform_5(%arg0: i32, %arg1: i32) -> (i32, i32) {
    %c0_i32 = arith.constant 0 : i32
    %c0_i32_0 = arith.constant 0 : i32
    return %arg0, %c0_i32 : i32, i32
  }
  func.func @transform_6(%arg0: i32, %arg1: i32) -> (i32, i32, i32) {
    %c0_i32 = arith.constant 0 : i32
    %c0_i32_0 = arith.constant 0 : i32
    return %arg0, %c0_i32, %arg1 : i32, i32, i32
  }
}

</mosaic_0001>

<bundles_post_ra>
// kernel: tpu_custom_call.1
= control target key start
LH: loop header
LB: loop body
LE: loop exit
PB: predicated region body
PF: predicated region fallthrough
CT: control target
= control target key end

     0   :  { %12 = vsyncpa [#allocation5], 0  ;;  %s655_s0 = inlined_call_operand.hbm [shape: f32[2,8,32], index: 0, kind: input, shape index: {}]   ;;  %s656_s1 = inlined_call_operand.hbm [shape: f32[32,64], index: 1, kind: input, shape index: {}]   ;;  %s657_s2 = inlined_call_operand.hbm [shape: f32[32,32], index: 2, kind: input, shape index: {}]   ;;  %s658_s3 = inlined_call_operand.vmem [shape: f32[1,32], index: 3, kind: input, shape index: {}]   ;;  %s659_s4 = inlined_call_operand.vmem [shape: f32[1,32], index: 4, kind: input, shape index: {}]   ;;  %s660_s5 = inlined_call_operand.hbm [shape: f32[2,32], index: 5, kind: output, shape index: {0}]   ;;  %s661_s6 = inlined_call_operand.hbm [shape: f32[2,8,8], index: 6, kind: output, shape index: {1}]  }
   0x1   :  { %13 = vsyncpa [#allocation8], 0 }
   0x2   :  { %14 = vsyncpa [#allocation6], 0 }
   0x3   :  { %15 = vsyncpa [#allocation12], 0  ;;  %s33_s23 = sshll.u32 %s656_s1, 4  ;;  %s556_s24 = smov [#allocation7]   ;;  %s34_s23 = int_to_ptr.hbm [resolvable:$true] %s33_s23 }
   0x4   :  { %s35_s25 = sshll.u32 %s556_s24, 4  ;;  %s20_s28 = sshll.u32 %s655_s0, 4  ;;  %s36_s25 = int_to_ptr.vmem [resolvable:$true] %s35_s25  ;;  %s21_s28 = int_to_ptr.hbm [resolvable:$true] %s20_s28 }
   0x5   :  { %s557_s29 = smov 128   ;;  %s558_s30 = smov 8  }
   0x6   :  { %41 = dma.hbm_to_vmem [thread:$0]  %s34_s23, 512, %s36_s25, [#allocation8], %s557_s29, %s557_s29, %s558_s30  }
   0x7   :  { %s559_s7 = smov [#allocation4]   ;;  %s46_s1 = sshll.u32 %s657_s2, 4  ;;  %s47_s1 = int_to_ptr.hbm [resolvable:$true] %s46_s1 }
   0x8   :  { %s22_s8 = sshll.u32 %s559_s7, 4  ;;  %s560_s0 = smov [#allocation9]   ;;  %s23_s8 = int_to_ptr.vmem [resolvable:$true] %s22_s8 }
   0x9   :  { %28 = dma.hbm_to_vmem [thread:$0]  %s21_s28, 256, %s23_s8, [#allocation5], %s557_s29, %s557_s29, %s558_s30  }
   0xa   :  { %s48_s11 = sshll.u32 %s560_s0, 4  ;;  %s49_s11 = int_to_ptr.vmem [resolvable:$true] %s48_s11 }
   0xb   :  { %54 = dma.hbm_to_vmem [thread:$0]  %s47_s1, 512, %s49_s11, [#allocation8], %s557_s29, %s557_s29, %s558_s30  }
   0xc   :  { %548 = dma.done.wait [#allocation5], 256  }
   0xd   :  { %549 = vsyncadd [#allocation5], 4294967040 }
   0xe   :  { %550 = dma.done.wait [#allocation8], 1024  }
   0xf   :  { %551 = vsyncadd [#allocation8], 4294966272  ;;  %vm80_vm0 = vcmask 261120   ;;  %v79_v0 = vld [vmem:[#allocation7 + $0x18] sm:$0xff]  ;;  %v78_v1 = vld [vmem:[#allocation7 + $0x10] sm:$0xff]  ;;  %vm169_vm1 = vcmask 1041409  }
  0x10   :  { %96 = vmatpush.msra.mxu0 %v79_v0  ;;  %v75_v2 = vld [vmem:[#allocation4] sm:$0xff]  ;;  %v166_v3 = vld [vmem:[#allocation9 + $0x18] sm:$0xff]  ;;  %131 = vmatpush.msra.mxu1 %v79_v0  ;;  %v77_v4 = vld [vmem:[#allocation7 + $0x8] sm:$0xff]  ;;  %s561_s2 = smov 96   ;;  %vm193_vm2 = vcmask 254976   ;;  %v562_v29 = vmov 32.0  }
  0x11   :  { %185 = vmatpush.msra.mxu2 %v166_v3  ;;  %v165_v5 = vld [vmem:[#allocation9 + $0x10] sm:$0xff]  ;;  %v164_v6 = vld [vmem:[#allocation9 + $0x8] sm:$0xff]  ;;  %v149_v7 = vsel %vm80_vm0, %v75_v2, 0.0  ;;  %v148_v8 = vld [vmem:[#allocation4 + $0x8] sm:$0xff]  ;;  %416 = vrcp.f32 %v562_v29  ;;  %vm293_vm4 = vcmask 64512   ;;  %s563_s16 = smov [#allocation10]  }
  0x12   :  { %97 = vmatpush.msra.mxu0 %v78_v1  ;;  %132 = vmatpush.msra.mxu1 %v78_v1  ;;  %v150_v9 = vrot.slane %v149_v7, 4  ;;  %v76_v10 = vld [vmem:[#allocation7] sm:$0xff]  ;;  %v156_v11 = vsel %vm80_vm0, %v148_v8, 0.0  ;;  %s367_s17 = sshll.u32 %s563_s16, 4  ;;  %s369_s20 = sshll.u32 %s660_s5, 4  ;;  %s368_s17 = int_to_ptr.vmem [resolvable:$true] %s367_s17  ;;  %s370_s20 = int_to_ptr.hbm [resolvable:$true] %s369_s20 }
  0x13   :  { %186 = vmatpush.msra.mxu2 %v165_v5  ;;  %v163_v12 = vld [vmem:[#allocation9] sm:$0xff]  ;;  %v157_v14 = vrot.slane %v156_v11, 4  ;;  %s379_s22 = sshll.u32 %s661_s6, 4  ;;  %s380_s22 = int_to_ptr.hbm [resolvable:$true] %s379_s22 }
  0x14   :  { %98 = vmatpush.msra.mxu0 %v77_v4  ;;  %133 = vmatpush.msra.mxu1 %v77_v4  ;;  %v151_v13 = vadd.f32 %v150_v9, %v149_v7  ;;  %v414_v9 = vld [vmem:[%s658_s3] ss:$0 sm:$0xff]  ;;  %s564_s3 = smov [#allocation11]  }
  0x15   :  { %187 = vmatpush.msra.mxu2 %v164_v6  ;;  %v158_v16 = vadd.f32 %v157_v14, %v156_v11 }
  0x16   :  { %99 = vmatpush.msra.mxu0 %v76_v10  ;;  %134 = vmatpush.msra.mxu1 %v76_v10  ;;  %v152_v15 = vrot.slane %v151_v13, 2 }
  0x17   :  { %398 = vmatmul.msk.f32.vlgmr.msra.gmra.mxu0 %vm80_vm0, %v75_v2  ;;  %188 = vmatpush.msra.mxu2 %v163_v12  ;;  %v159_v18 = vrot.slane %v158_v16, 2  ;;  %v417_v30 = vpop.eup %416 }
  0x18   :  { %v153_v17 = vadd.f32 %v152_v15, %v151_v13  ;;  %399 = vmatmul.msk.f32.vlgmr.msra.gmra.mxu1 %vm80_vm0, %v148_v8  ;;  %v198_v32 = vmul.f32 32.0, %v417_v30  ;;  %vm202_vm3 = vweird.f32 %v417_v30  ;;  %v415_v13 = vld [vmem:[%s659_s4] ss:$0 sm:$0xff]  ;;  %s377_s4 = sshll.u32 %s564_s3, 4  ;;  %s378_s4 = int_to_ptr.vmem [resolvable:$true] %s377_s4 }
  0x19   :  { %v160_v20 = vadd.f32 %v159_v18, %v158_v16 }
  0x1a   :  { %v154_v19 = vrot.slane %v153_v17, 1  ;;  %v199_v33 = vsub.f32 1.0, %v198_v32 }
  0x1b   :  { %v161_v22 = vrot.slane %v160_v20, 1 }
  0x1c   :  { %v155_v21 = vadd.f32 %v154_v19, %v153_v17  ;;  %v200_v36 = vmul.f32 %v417_v30, %v199_v33 }
  0x1d   :  { %v162_v23 = vadd.f32 %v161_v22, %v160_v20 }
  0x1e   :  { %v201_v38 = vadd.f32 %v417_v30, %v200_v36 }
  0x1f   :  { %v170_v24 = vsel %vm169_vm1, %v162_v23, %v155_v21 }
  0x20   :  { %400 = vmatmul.msk.f32.vlgmr.msra.gmra.mxu2 %vm80_vm0, %v170_v24  ;;  %v203_v39 = vsel %vm202_vm3, %v417_v30, %v201_v38 }
  0x94   :  { %v101_v25 = vpop.f32.mrf.mxu0 }
  0x95   :  { %104 = vst.msk [vmem:[#allocation2] sm:$0xff] %vm80_vm0, %v101_v25  ;;  %106 = vrot.lane.b32.xlu0 %v101_v25, %s561_s2  ;;  %v136_v26 = vpop.f32.mrf.mxu1 }
  0x96   :  { %140 = vst.msk [vmem:[#allocation2 + $0x8] sm:$0xff] %vm80_vm0, %v136_v26 }
  0x9c   :  { %v238_v37 = vld [vmem:[#allocation2] sm:$0xff] }
  0x9d   :  { %142 = vrot.lane.b32.xlu0 %v136_v26, %s561_s2  ;;  %v239_v43 = vld [vmem:[#allocation2 + $0x8] sm:$0xff] }
  0xa3   :  { %v190_v27 = vpop.f32.mrf.mxu2 }
  0xa4   :  { %v194_v28 = vsel %vm193_vm2, %v190_v27, 0.0 }
  0xa5   :  { %195 = vadd.xlane.f32.xlu1 %v194_v28 }
 0x107   :  { %v107_v31 = vpop.permute.xlu0 %106 }
 0x108   :  { %109 = vst.msk [vmem:[#allocation3] sm:$0xff] %vm80_vm0, %v107_v31 }
 0x10f   :  { %v143_v34 = vpop.permute.xlu0 %142  ;;  %v236_v35 = vld [vmem:[#allocation3] sm:$0xff] }
 0x110   :  { %146 = vst.msk [vmem:[#allocation3 + $0x8] sm:$0xff] %vm80_vm0, %v143_v34  ;;  %401 = vmatpush.xpose.msk.msra.mxu3 %vm80_vm0, %v236_v35 }
 0x113   :  { %402 = vmatmul.msk.f32.vlgmr.msra.gmra.mxu3 %vm80_vm0, %v238_v37 }
 0x117   :  { %v237_v40 = vld [vmem:[#allocation3 + $0x8] sm:$0xff] }
 0x118   :  { %403 = vmatpush.xpose.msk.msrb.mxu3 %vm80_vm0, %v237_v40  ;;  %v196_v41 = vpop.xlane.xlu1 %195 }
 0x119   :  { %v204_v42 = vmul.f32 %v203_v39, %v196_v41 }
 0x11b   :  { %404 = vmatmul.msk.f32.vlgmr.msrb.gmra.mxu3 %vm80_vm0, %v239_v43  ;;  %v205_v44 = vsub.f32 %v190_v27, %v204_v42 }
 0x11d   :  { %v206_v45 = vmul.f32 %v205_v44, %v205_v44 }
 0x11f   :  { %v207_v46 = vsel %vm193_vm2, %v206_v45, 0.0 }
 0x120   :  { %208 = vadd.xlane.f32.xlu1 %v207_v46 }
 0x193   :  { %v209_v47 = vpop.xlane.xlu1 %208 }
 0x194   :  { %v210_v48 = vmul.f32 %v209_v47, %v203_v39 }
 0x196   :  { %v264_v49 = vpop.f32.mrf.mxu3  ;;  %v211_v50 = vadd.f32 1e-05, %v210_v48 }
 0x197   :  { %v294_v51 = vsel %vm293_vm4, %v264_v49, -inf }
 0x198   :  { %v295_v52 = vrot.slane %v294_v51, 4  ;;  %418 = vrsqrt.f32 %v211_v50  ;;  %vm218_vm6 = vweird.f32 %v211_v50 }
 0x19a   :  { %v296_v53 = vmax.f32 %v294_v51, %v295_v52 }
 0x19c   :  { %v297_v54 = vrot.slane %v296_v53, 2 }
 0x19e   :  { %v298_v55 = vmax.f32 %v296_v53, %v297_v54  ;;  %v290_v56 = vpop.f32.mrf.mxu3  ;;  %v419_v57 = vpop.eup %418 }
 0x19f   :  { %v301_v58 = vsel %vm293_vm4, %v290_v56, -inf  ;;  %v213_v59 = vmul.f32 %v419_v57, %v211_v50  ;;  %vm219_vm5 = vweird.f32 %v419_v57 }
 0x1a0   :  { %v299_v60 = vrot.slane %v298_v55, 1  ;;  %v302_v61 = vrot.slane %v301_v58, 4  ;;  %vm220_vm7 = vmor %vm218_vm6, %vm219_vm5 }
 0x1a1   :  { %v214_v62 = vmul.f32 %v419_v57, %v213_v59 }
 0x1a2   :  { %v300_v63 = vmax.f32 %v298_v55, %v299_v60  ;;  %v303_v0 = vmax.f32 %v301_v58, %v302_v61 }
 0x1a3   :  { %v215_v1 = vmul.f32 0.5, %v214_v62 }
 0x1a4   :  { %v308_v2 = vsub.f32 %v264_v49, %v300_v63  ;;  %v304_v3 = vrot.slane %v303_v0, 2 }
 0x1a5   :  { %v216_v4 = vsub.f32 1.5, %v215_v1 }
 0x1a6   :  { %v310_v5 = vmul.f32 1.442695, %v308_v2  ;;  %v305_v6 = vmax.f32 %v303_v0, %v304_v3 }
 0x1a7   :  { %v217_v7 = vmul.f32 %v419_v57, %v216_v4 }
 0x1a8   :  { %420 = vpow2.f32 %v310_v5  ;;  %v306_v8 = vrot.slane %v305_v6, 1 }
 0x1a9   :  { %v221_v10 = vsel %vm220_vm7, %v419_v57, %v217_v7 }
 0x1aa   :  { %v307_v11 = vmax.f32 %v305_v6, %v306_v8  ;;  %v222_v12 = vmul.f32 %v221_v10, %v205_v44 }
 0x1ac   :  { %v309_v14 = vsub.f32 %v290_v56, %v307_v11  ;;  %v227_v15 = vmul.f32 %v414_v9, %v222_v12 }
 0x1ae   :  { %v421_v16 = vpop.eup %420  ;;  %v312_v17 = vmul.f32 1.442695, %v309_v14  ;;  %v232_v19 = vadd.f32 %v415_v13, %v227_v15 }
 0x1af   :  { %v314_v18 = vsel %vm293_vm4, %v421_v16, 0.0 }
 0x1b0   :  { %v315_v20 = vrot.slane %v314_v18, 4  ;;  %422 = vpow2.f32 %v312_v17  ;;  %233 = vst.msk [vmem:[#allocation10] sm:$0x3] %vm193_vm2, %v232_v19 }
 0x1b1   :  { %372 = dma.vmem_to_hbm [thread:$0]  %s368_s17, 32, %s370_s20, [#allocation6]  }
 0x1b2   :  { %v316_v21 = vadd.f32 %v315_v20, %v314_v18 }
 0x1b4   :  { %v317_v22 = vrot.slane %v316_v21, 2 }
 0x1b6   :  { %v423_v23 = vpop.eup %422  ;;  %v318_v24 = vadd.f32 %v317_v22, %v316_v21 }
 0x1b7   :  { %v321_v25 = vsel %vm293_vm4, %v423_v23, 0.0 }
 0x1b8   :  { %v319_v26 = vrot.slane %v318_v24, 1  ;;  %v322_v27 = vrot.slane %v321_v25, 4 }
 0x1ba   :  { %v320_v28 = vadd.f32 %v319_v26, %v318_v24  ;;  %v323_v29 = vadd.f32 %v322_v27, %v321_v25 }
 0x1bc   :  { %424 = vrcp.f32 %v320_v28  ;;  %v324_v30 = vrot.slane %v323_v29, 2  ;;  %v339_v37 = vand.u32 2147483648, %v320_v28  ;;  %v337_v39 = vand.u32 2147483647, %v320_v28 }
 0x1bd   :  { %vm333_vm9 = vweird.f32 %v320_v28 }
 0x1be   :  { %v325_v31 = vadd.f32 %v324_v30, %v323_v29  ;;  %v340_v41 = vor.u32 1.1754944e-38, %v339_v37  ;;  %vm338_vm11 = vcmp.eq.f32.partialorder %v337_v39, 8.507059e+37 }
 0x1c0   :  { %v326_v32 = vrot.slane %v325_v31, 1 }
 0x1c2   :  { %v425_v33 = vpop.eup %424  ;;  %v327_v35 = vadd.f32 %v326_v32, %v325_v31 }
 0x1c3   :  { %v329_v34 = vmul.f32 %v425_v33, %v320_v28  ;;  %vm334_vm8 = vweird.f32 %v425_v33 }
 0x1c4   :  { %426 = vrcp.f32 %v327_v35  ;;  %vm335_vm10 = vmor %vm333_vm9, %vm334_vm8  ;;  %v354_v48 = vand.u32 2147483648, %v327_v35  ;;  %v352_v50 = vand.u32 2147483647, %v327_v35  ;;  %vm348_vm13 = vweird.f32 %v327_v35 }
 0x1c5   :  { %v330_v36 = vsub.f32 1.0, %v329_v34 }
 0x1c6   :  { %v355_v52 = vor.u32 1.1754944e-38, %v354_v48  ;;  %vm353_vm15 = vcmp.eq.f32.partialorder %v352_v50, 8.507059e+37 }
 0x1c7   :  { %v331_v38 = vmul.f32 %v425_v33, %v330_v36 }
 0x1c9   :  { %v332_v40 = vadd.f32 %v425_v33, %v331_v38 }
 0x1ca   :  { %v427_v42 = vpop.eup %426 }
 0x1cb   :  { %v336_v43 = vsel %vm335_vm10, %v425_v33, %v332_v40  ;;  %v344_v45 = vmul.f32 %v427_v42, %v327_v35  ;;  %vm349_vm12 = vweird.f32 %v427_v42 }
 0x1cc   :  { %v341_v44 = vsel %vm338_vm11, %v340_v41, %v336_v43  ;;  %vm350_vm14 = vmor %vm348_vm13, %vm349_vm12 }
 0x1cd   :  { %v358_v46 = vmul.f32 %v421_v16, %v341_v44  ;;  %v345_v47 = vsub.f32 1.0, %v344_v45 }
 0x1cf   :  { %360 = vst.msk [vmem:[#allocation11] sm:$0xff] %vm293_vm4, %v358_v46  ;;  %v346_v49 = vmul.f32 %v427_v42, %v345_v47 }
 0x1d1   :  { %v347_v51 = vadd.f32 %v427_v42, %v346_v49 }
 0x1d3   :  { %v351_v53 = vsel %vm350_vm14, %v427_v42, %v347_v51 }
 0x1d4   :  { %v356_v54 = vsel %vm353_vm15, %v355_v52, %v351_v53 }
 0x1d5   :  { %v359_v55 = vmul.f32 %v423_v23, %v356_v54 }
 0x1d7   :  { %361 = vst.msk [vmem:[#allocation11 + $0x8] sm:$0xff] %vm293_vm4, %v359_v55 }
 0x1d8   :  { %385 = dma.vmem_to_hbm [thread:$0]  %s378_s4, 256, %s380_s22, [#allocation12], %s557_s29, %s557_s29, %s558_s30  }
 0x1d9   :  { %552 = dma.done.wait [#allocation6], 32  }
 0x1da   :  { %553 = vsyncadd [#allocation6], 4294967264 }
 0x1db   :  { %554 = dma.done.wait [#allocation12], 256  }
 0x1dc   :  { %555 = vsyncadd [#allocation12], 4294967040 }
 0x1dd   :  { %394 = vsyncpa [#allocation5], 1 }
 0x1de   :  { %395 = vsyncpa [#allocation8], 1 }
 0x1df   :  { %396 = vsyncpa [#allocation6], 1 }
 0x1e0   :  { %397 = vsyncpa [#allocation12], 1 }

</bundles_post_ra>
